<compile_context>
chip_gen: v5e
topology: v5e:2x2
jax: 0.10.0
libtpu: 0.0.40
codegen_flags: <defaults>
</compile_context>

<pallas_src>
import jax
import jax.numpy as jnp
from jax.experimental import pallas as pl
from jax.experimental.pallas import tpu as pltpu


_SMALL_C_VPU_THRESHOLD = 64  # below this, K is too small to bother the MXU


def _round_up(x, m):
    return (x + m - 1) // m * m


def residual_pointwise_kernel(x_ref, w_ref, b_ref, o_ref):
    # x_ref : (1, C, thw)   tile of (N, C, H*W), channels on sublanes, pixels on lanes
    # w_ref : (C_out, C_in) pointwise conv weight
    # b_ref : (C_out, 1)    bias (broadcasts over the lane axis)
    # o_ref : (1, C, thw)
    x = x_ref[0]                                   # (C, thw)
    xf = x.astype(jnp.float32)
    bf = b_ref[...].astype(jnp.float32)            # (C, 1)
    C = x.shape[0]

    if C < _SMALL_C_VPU_THRESHOLD:
        # 1x1 conv as C broadcast multiply-adds on the VPU (MXU gives nothing at K=C tiny).
        wf = w_ref[...].astype(jnp.float32)        # (C_out, C_in)
        fx = jnp.broadcast_to(bf, xf.shape)        # (C, thw)
        for ci in range(C):
            fx = fx + wf[:, ci:ci + 1] * xf[ci:ci + 1, :]
    else:
        # out[o, p] = sum_c w[o, c] * x[c, p]  (f32 accumulation on the MXU)
        fx = jnp.dot(w_ref[...], x, preferred_element_type=jnp.float32) + bf

    # Residual.forward: fn(x) + x  (residual add in f32, then cast back)
    o_ref[0] = (fx + xf).astype(o_ref.dtype)


def residual_forward(x_nchw, w, b, *, tile_hw=None,
                     vmem_budget_bytes=48 * 1024 * 1024):
    """fn(x) + x with fn = pointwise 1x1 conv; w is (C_out, C_in), b is (C,)."""
    N, C, H, W = x_nchw.shape
    HW = H * W
    itemsize = jnp.dtype(x_nchw.dtype).itemsize

    # --- pick the lane tile: as large as possible under the VMEM budget -----
    # double-buffered x + out tiles, double-buffered weight + bias
    if tile_hw is None:
        tl = 2048
        while tl > 128 and (4 * C * tl * itemsize          # x + out, 2 bufs each
                            + 2 * C * C * itemsize         # weight, 2 bufs
                            + 2 * C * 4) > vmem_budget_bytes:
            tl //= 2
        tile_hw = min(tl, _round_up(HW, 128))
    tile_hw = max(128, _round_up(tile_hw, 128))

    # --- pad H*W up to a tile multiple (no divisibility requirement) --------
    HW_pad = _round_up(HW, tile_hw)
    x3 = x_nchw.reshape(N, C, HW)                  # free reshape, stays NCHW
    if HW_pad != HW:
        x3 = jnp.pad(x3, ((0, 0), (0, 0), (0, HW_pad - HW)))

    grid = (N, HW_pad // tile_hw)

    vmem_need = (4 * C * tile_hw * itemsize        # x + out tiles, double-buffered
                 + 2 * C * C * itemsize            # weight (replicated, double-buffered)
                 + 2 * C * 4)                      # bias
    # Explicit limit with headroom; capped at v7x's 64 MiB physical VMEM.
    vmem_limit = int(min(max(2 * vmem_need, 32 * 1024 * 1024), 64 * 1024 * 1024))
    # Note: on v7x with very large C the replicated weight could additionally be
    # single-buffered (pipeline_mode=pl.Buffered(1)) or DMA'd once into scratch;
    # negligible at these sizes so we keep the default double buffer.

    out3 = pl.pallas_call(
        residual_pointwise_kernel,
        out_shape=jax.ShapeDtypeStruct((N, C, HW_pad), x_nchw.dtype),
        grid_spec=pltpu.PrefetchScalarGridSpec(
            num_scalar_prefetch=0,
            grid=grid,
            in_specs=[
                pl.BlockSpec((1, C, tile_hw), lambda n, j: (n, 0, j)),  # x tile
                pl.BlockSpec((C, C), lambda n, j: (0, 0)),              # weight (replicated)
                pl.BlockSpec((C, 1), lambda n, j: (0, 0)),              # bias   (replicated)
            ],
            out_specs=pl.BlockSpec((1, C, tile_hw), lambda n, j: (n, 0, j)),
        ),
        compiler_params=pltpu.CompilerParams(
            dimension_semantics=("parallel", "parallel"),
            vmem_limit_bytes=vmem_limit,
        ),
    )(x3, w, b.reshape(C, 1))

    if HW_pad != HW:
        out3 = out3[:, :, :HW]
    return out3.reshape(N, C, H, W)


if __name__ == "__main__":
    key = jax.random.PRNGKey(0)
    kx, kw, kb = jax.random.split(key, 3)

    N, C, H, W = 2, 4, 16, 16
    x = jax.random.normal(kx, (N, C, H, W), dtype=jnp.float32)
    # deterministic "fn" parameters: 1x1 conv weight (C_out, C_in) and bias
    w = jax.random.normal(kw, (C, C), dtype=jnp.float32) * 0.1
    b = jax.random.normal(kb, (C,), dtype=jnp.float32) * 0.1

    out = residual_forward(x, w, b)
    jax.block_until_ready(out)

    # reference: fn(x) + x with fn = pointwise conv, computed in plain JAX (NCHW)
    x3 = x.reshape(N, C, H * W)
    ref = (jnp.einsum('oc,ncp->nop', w, x3) + b[None, :, None] + x3).reshape(N, C, H, W)
    assert jnp.allclose(out, ref, atol=1e-5, rtol=1e-5), "mismatch vs reference"

    print("KERNEL_OK")
</pallas_src>

<mosaic_0001>
module attributes {stable_mosaic.version = 11 : i64} {
  func.func @residual_pointwise_kernel(%arg0: i32, %arg1: i32, %arg2: memref<1x4x256xf32, #tpu.memory_space<vmem>>, %arg3: memref<4x4xf32, #tpu.memory_space<vmem>>, %arg4: memref<4x1xf32, #tpu.memory_space<vmem>>, %arg5: memref<1x4x256xf32, #tpu.memory_space<vmem>>) attributes {dimension_semantics = [#tpu.dimension_semantics<parallel>, #tpu.dimension_semantics<parallel>], iteration_bounds = array<i64: 2, 1>, scalar_prefetch = 0 : i64, scratch_operands = 0 : i64, tpu.core_type = #tpu.core_type<tc>, window_params = [{transform_indices = @transform_0, window_bounds = array<i64: 1, 4, 256>}, {pipeline_mode = #tpu.pipeline_mode<synchronous>, transform_indices = @transform_1, window_bounds = array<i64: 4, 4>}, {pipeline_mode = #tpu.pipeline_mode<synchronous>, transform_indices = @transform_2, window_bounds = array<i64: 4, 1>}, {transform_indices = @transform_3, window_bounds = array<i64: 1, 4, 256>}]} {
    %c0 = arith.constant 0 : index
    %c0_0 = arith.constant 0 : index
    %c0_1 = arith.constant 0 : index
    %0 = vector.load %arg2[%c0, %c0_0, %c0_1] : memref<1x4x256xf32, #tpu.memory_space<vmem>>, vector<1x4x256xf32>
    %1 = vector.shape_cast %0 : vector<1x4x256xf32> to vector<4x256xf32>
    %c0_2 = arith.constant 0 : index
    %c0_3 = arith.constant 0 : index
    %2 = vector.load %arg4[%c0_2, %c0_3] : memref<4x1xf32, #tpu.memory_space<vmem>>, vector<4x1xf32>
    %c0_4 = arith.constant 0 : index
    %c0_5 = arith.constant 0 : index
    %3 = vector.load %arg3[%c0_4, %c0_5] : memref<4x4xf32, #tpu.memory_space<vmem>>, vector<4x4xf32>
    %4 = vector.shape_cast %2 : vector<4x1xf32> to vector<4x1xf32>
    %5 = vector.broadcast %4 : vector<4x1xf32> to vector<4x256xf32>
    %6 = vector.extract_strided_slice %3 {offsets = [0, 0], sizes = [4, 1], strides = [1, 1]} : vector<4x4xf32> to vector<4x1xf32>
    %7 = vector.extract_strided_slice %1 {offsets = [0, 0], sizes = [1, 256], strides = [1, 1]} : vector<4x256xf32> to vector<1x256xf32>
    %8 = vector.broadcast %6 : vector<4x1xf32> to vector<4x256xf32>
    %9 = vector.broadcast %7 : vector<1x256xf32> to vector<4x256xf32>
    %10 = arith.mulf %8, %9 : vector<4x256xf32>
    %11 = arith.addf %5, %10 : vector<4x256xf32>
    %12 = vector.extract_strided_slice %3 {offsets = [0, 1], sizes = [4, 1], strides = [1, 1]} : vector<4x4xf32> to vector<4x1xf32>
    %13 = vector.extract_strided_slice %1 {offsets = [1, 0], sizes = [1, 256], strides = [1, 1]} : vector<4x256xf32> to vector<1x256xf32>
    %14 = vector.broadcast %12 : vector<4x1xf32> to vector<4x256xf32>
    %15 = vector.broadcast %13 : vector<1x256xf32> to vector<4x256xf32>
    %16 = arith.mulf %14, %15 : vector<4x256xf32>
    %17 = arith.addf %11, %16 : vector<4x256xf32>
    %18 = vector.extract_strided_slice %3 {offsets = [0, 2], sizes = [4, 1], strides = [1, 1]} : vector<4x4xf32> to vector<4x1xf32>
    %19 = vector.extract_strided_slice %1 {offsets = [2, 0], sizes = [1, 256], strides = [1, 1]} : vector<4x256xf32> to vector<1x256xf32>
    %20 = vector.broadcast %18 : vector<4x1xf32> to vector<4x256xf32>
    %21 = vector.broadcast %19 : vector<1x256xf32> to vector<4x256xf32>
    %22 = arith.mulf %20, %21 : vector<4x256xf32>
    %23 = arith.addf %17, %22 : vector<4x256xf32>
    %24 = vector.extract_strided_slice %3 {offsets = [0, 3], sizes = [4, 1], strides = [1, 1]} : vector<4x4xf32> to vector<4x1xf32>
    %25 = vector.extract_strided_slice %1 {offsets = [3, 0], sizes = [1, 256], strides = [1, 1]} : vector<4x256xf32> to vector<1x256xf32>
    %26 = vector.broadcast %24 : vector<4x1xf32> to vector<4x256xf32>
    %27 = vector.broadcast %25 : vector<1x256xf32> to vector<4x256xf32>
    %28 = arith.mulf %26, %27 : vector<4x256xf32>
    %29 = arith.addf %23, %28 : vector<4x256xf32>
    %30 = arith.addf %29, %1 : vector<4x256xf32>
    %c0_6 = arith.constant 0 : index
    %c0_7 = arith.constant 0 : index
    %c0_8 = arith.constant 0 : index
    %31 = vector.load %arg5[%c0_6, %c0_7, %c0_8] : memref<1x4x256xf32, #tpu.memory_space<vmem>>, vector<1x4x256xf32>
    %32 = vector.shape_cast %31 : vector<1x4x256xf32> to vector<4x256xf32>
    %33 = vector.shape_cast %30 : vector<4x256xf32> to vector<1x4x256xf32>
    tpu.vector_store %arg5[%c0_6, %c0_7, %c0_8], %33 {strides = array<i32>} : memref<1x4x256xf32, #tpu.memory_space<vmem>>, vector<1x4x256xf32>,
    return
  }
  func.func @transform_0(%arg0: i32, %arg1: i32) -> (i32, i32, i32) {
    %c0_i32 = arith.constant 0 : i32
    %c0_i32_0 = arith.constant 0 : i32
    return %arg0, %c0_i32, %arg1 : i32, i32, i32
  }
  func.func @transform_1(%arg0: i32, %arg1: i32) -> (i32, i32) {
    %c0_i32 = arith.constant 0 : i32
    %c0_i32_0 = arith.constant 0 : i32
    %c0_i32_1 = arith.constant 0 : i32
    return %c0_i32, %c0_i32_0 : i32, i32
  }
  func.func @transform_2(%arg0: i32, %arg1: i32) -> (i32, i32) {
    %c0_i32 = arith.constant 0 : i32
    %c0_i32_0 = arith.constant 0 : i32
    %c0_i32_1 = arith.constant 0 : i32
    return %c0_i32, %c0_i32_0 : i32, i32
  }
  func.func @transform_3(%arg0: i32, %arg1: i32) -> (i32, i32, i32) {
    %c0_i32 = arith.constant 0 : i32
    %c0_i32_0 = arith.constant 0 : i32
    return %arg0, %c0_i32, %arg1 : i32, i32, i32
  }
}

</mosaic_0001>

<bundles_post_ra>
// kernel: tpu_custom_call.1
= control target key start
LH: loop header
LB: loop body
LE: loop exit
PB: predicated region body
PF: predicated region fallthrough
CT: control target
= control target key end

     0   :  { %8 = vsyncpa [#allocation3], 0  ;;  %s748_s0 = inlined_call_operand.hbm [shape: f32[2,4,256], index: 0, kind: input, shape index: {}]   ;;  %s749_s1 = inlined_call_operand.vmem [shape: f32[4,4], index: 1, kind: input, shape index: {}]   ;;  %s750_s2 = inlined_call_operand.vmem [shape: f32[4,1], index: 2, kind: input, shape index: {}]   ;;  %s751_s3 = inlined_call_operand.hbm [shape: f32[2,4,256], index: 3, kind: output, shape index: {}]  }
   0x1   :  { %10 = vsyncpa [#allocation3 + $0x1], 0 }
   0x2   :  { %11 = vsyncpa [#allocation4], 0 }
   0x3   :  { %13 = vsyncpa [#allocation4 + $0x1], 0  ;;  %s618_s12 = smov 0   ;;  %s620_s13 = smov 0  }
   0x4   :  { %s622_s14 = smov 0   ;;  %s624_s15 = smov 0  }
   0x5   :  { %s626_s16 = smov 0   ;;  %s628_s17 = smov 0  }
   0x6 LB: > { %s392_s18 = sadd.s32 4294967295, %s592_s17   ;;  %s393_s19 = sadd.s32 4294967294, %s592_s17   ;;  %s592_s17 = sphi %s628_s17, %s19_s17   ;;  %s588_s16 = sphi %s626_s16, %s760_s16   ;;  %s584_s15 = sphi %s624_s15, %s759_s15   ;;  %s580_s14 = sphi %s622_s14, %s758_s14   ;;  %s576_s13 = sphi %s620_s13, %s757_s13   ;;  %s572_s12 = sphi %s618_s12, %s756_s12  }
   0x7   : > { %s31_s20 = sadd.s32 1, %s588_s16  ;;  %s40_s21 = sadd.s32 1, %s580_s14 }
   0x8   : > { %p33_p0 = scmp.ge.s32.totalorder %s31_s20, 2  ;;  %p47_p1 = scmp.ne.s32.totalorder %s580_s14, %s576_s13 }
   0x9   : > { %p48_p2 = scmp.eq.s32.totalorder %s592_s17, 0  ;;  %p53_p3 = scmp.ne.s32.totalorder %s576_s13, %s572_s12 }
   0xa   : > { %s762_s20 = smov (%p33_p0, %s31_s20), 0  ;;  %p54_p5 = scmp.eq.s32.totalorder %s392_s18, 0 }
   0xb   : > { %p659_p4 = por %p48_p2, %p47_p1  ;;  %s35_s23 = ssub.s32 %s588_s16, %s762_s20 }
   0xc   : > { %p121_p6 = scmp.eq.s32.totalorder %s392_s18, 1  ;;  %p38_p7 = scmp.eq.s32.totalorder %s35_s23, 0 }
   0xd   : > { %p665_p8 = por %p54_p5, %p53_p3  ;;  %p127_p10 = scmp.eq.s32.totalorder %s393_s19, 1 }
   0xe   : > { %p669_p9 = por %p121_p6, %p47_p1  ;;  %p395_p12 = scmp.ge.s32.totalorder %s592_s17, 2 }
   0xf   : > { %s674_s26 = scalar_select %p38_p7, %s580_s14, %s40_s21  }
  0x10   : > { %p676_p11 = por %p127_p10, %p53_p3  ;;  %p421_p13 = scmp.lt.s32.totalorder %s592_s17, 2 }
  0x11   : > { %s153_s28 = sand.u32 1, %s580_s14   ;;  %s407_s30 = sshll.u32 %s588_s16, 3 }
  0x12   : > { %s396_s29 = sshll.u32 %s153_s28, 3  ;;  %s164_s6 = scalar_lea.hbm %s748_s0, %s407_s30 }
  0x13   : > { %s157_s7 = scalar_lea.vmem [#allocation2], %s396_s29  ;;  %s166_s9 = sshll.u32 %s164_s6, 4  ;;  %s167_s9 = int_to_ptr.hbm [resolvable:$true] %s166_s9 }
  0x14   : > { %s168_s8 = sshll.u32 %s157_s7, 4  ;;  %p414_p0 = pnand %p421_p13, %p659_p4  ;;  %s169_s8 = int_to_ptr.vmem [resolvable:$true] %s168_s8 }
  0x15   : > { %p399_p1 = scmp.ge.s32.totalorder %s592_s17, 1  ;;  %p173_p2 = scmp.lt.s32.totalorder %s592_s17, 3 }
  0x16   : > { %s154_s10 = scalar_lea.sflag [#allocation3], %s153_s28 }
  0x17   : > { %416 = dma.hbm_to_vmem [thread:$0]  (!%p414_p0), %s167_s9, 128, %s169_s8, %s154_s10  }
  0x18   : > { %p174_p3 = pnand %p399_p1, %p173_p2 }
  0x19   : > { %s692_s11 = sand.u32 (!%p174_p3), 1, %s576_s13  }
  0x1a   : > { %177 = sbr.rel (%p174_p3) target bundleno = 173 (0xad), region = 32  ;;  %s400_s18 = sshll.u32 (!%p174_p3), %s692_s11, 3 }
  0x1b   : > { %s180_s19 = scalar_lea.sflag (!%p174_p3), [#allocation3], %s692_s11  ;;  %s183_s21 = scalar_lea.vmem (!%p174_p3), [#allocation2], %s400_s18 }
  0x1f   : > { %563 = dma.done.wait (%p665_p8), %s180_s19, 128  }
  0x20   : > { %565 = vsyncadd (%p665_p8), %s180_s19, 4294967168  ;;  %v594_v0 = vmov 0   ;;  %v595_v1 = vmov 1   ;;  %v596_v2 = vmov 3   ;;  %v209_v3 = vld [vmem:[%s183_s21] sm:$0xff]  ;;  %v597_v6 = vmov 2  }
  0x21   : > { %475 = vset.pattern.permute.xlu0 %v594_v0  ;;  %476 = vset.pattern.permute.xlu1 %v595_v1  ;;  %v211_v4 = vld [vmem:[%s749_s1] sm:$0xf]  ;;  %275 = vst [vmem:[#allocation1] ss:$2 sm:$0xff] %v209_v3  ;;  %v223_v7 = vperm.slane %v209_v3, 0  ;;  %v224_v8 = vperm.slane %v209_v3, 4 }
  0x22   : > { %478 = vset.pattern.permute.xlu2 %v596_v2  ;;  %219 = vperm.xlu0 %475, %v211_v4   ;;  %v210_v5 = vld [vmem:[%s750_s2] sm:$0xf]  ;;  %v237_v11 = vperm.slane %v209_v3, 1  ;;  %v238_v12 = vperm.slane %v209_v3, 5  ;;  %v251_v13 = vperm.slane %v209_v3, 2  ;;  %v252_v14 = vperm.slane %v209_v3, 6 }
  0x23   : > { %234 = vperm.xlu1 %476, %v211_v4   ;;  %262 = vperm.xlu2 %478, %v211_v4   ;;  %v227_v15 = vperm.slane %v223_v7, 0  ;;  %v228_v16 = vperm.slane %v224_v8, 0  ;;  %v265_v17 = vperm.slane %v209_v3, 3  ;;  %v266_v18 = vperm.slane %v209_v3, 7  ;;  %s408_s24 = sshll.u32 %s584_s15, 3  ;;  %s206_s6 = scalar_lea.vmem [#allocation5], %s400_s18 }
  0x24   : > { %v241_v19 = vperm.slane %v237_v11, 1  ;;  %v242_v20 = vperm.slane %v238_v12, 1  ;;  %v255_v21 = vperm.slane %v251_v13, 2  ;;  %v256_v22 = vperm.slane %v252_v14, 2  ;;  %s303_s5 = scalar_lea.hbm %s751_s3, %s408_s24  ;;  %s305_s7 = sshll.u32 %s206_s6, 4  ;;  %s306_s7 = int_to_ptr.vmem [resolvable:$true] %s305_s7 }
  0x25   : > { %v269_v25 = vperm.slane %v265_v17, 3  ;;  %v270_v26 = vperm.slane %v266_v18, 3  ;;  %s307_s8 = sshll.u32 %s303_s5, 4  ;;  %vm285_vm0 = vcmask 1043456   ;;  %s290_s15 = scalar_lea.sflag [#allocation4], %s692_s11  ;;  %s308_s8 = int_to_ptr.hbm [resolvable:$true] %s307_s8 }
  0x26   : > { %s524_s9 = sshra.s32 %s308_s8, 4  ;;  %s530_s18 = scalar_lea.hbm %s751_s3, 16  ;;  %s525_s9 = int_to_ptr.hbm [resolvable:$true] %s524_s9 }
  0x27   : > { %s526_s10 = scalar_lea.hbm %s525_s9, 8  ;;  %p531_p7 = scmp.lt.s32.totalorder %s525_s9, %s751_s3 }
  0x28   : > { %v277_v42 = vld.sshfl [vmem:[#allocation1 + $0x8] sm:$0xff pattern:$0x75316420]  ;;  %v276_v45 = vld.sshfl [vmem:[#allocation1] sm:$0xff pattern:$0x75316420]  ;;  %p527_p4 = scmp.ne.s32.totalorder %s525_s9, %s526_s10  ;;  %p532_p8 = scmp.lt.s32.totalorder %s530_s18, %s526_s10 }
  0x2a   : > { %214 = vperm.xlu0 %475, %v210_v5   ;;  %p528_p5 = pnand %p527_p4, %p669_p9  ;;  %p533_p10 = por %p532_p8, %p531_p7 }
  0x2b   : > { %477 = vset.pattern.permute.xlu1 %v597_v6 }
  0x2c   : > { %248 = vperm.xlu1 %477, %v211_v4   ;;  %p529_p6 = pneg %p528_p5 }
  0x2e   : > { %p534_p13 = pnand %p533_p10, %p529_p6 }
  0x32   : > { %479 = vset.pattern.permute.xlu0 %v596_v2 }
  0x7d   : > { %v263_v28 = vpop.permute.xlu2 %262 }
  0x7e   : > { %v271_v38 = vmul.f32 %v269_v25, %v263_v28  ;;  %v272_v39 = vmul.f32 %v270_v26, %v263_v28 }
  0x94   : > { %v220_v9 = vpop.permute.xlu0 %219 }
  0x95   : > { %v235_v10 = vpop.permute.xlu1 %234  ;;  %v229_v23 = vmul.f32 %v227_v15, %v220_v9  ;;  %v230_v24 = vmul.f32 %v228_v16, %v220_v9 }
  0x96   : > { %v243_v29 = vmul.f32 %v241_v19, %v235_v10  ;;  %v244_v30 = vmul.f32 %v242_v20, %v235_v10 }
  0x9c   : > { %v215_v27 = vpop.permute.xlu0 %214 }
  0x9d   : > { %v231_v31 = vadd.f32 %v229_v23, %v215_v27  ;;  %v232_v32 = vadd.f32 %v230_v24, %v215_v27 }
  0x9e   : > { %v249_v33 = vpop.permute.xlu1 %248 }
  0x9f   : > { %v257_v34 = vmul.f32 %v255_v21, %v249_v33  ;;  %v258_v35 = vmul.f32 %v256_v22, %v249_v33  ;;  %v245_v36 = vadd.f32 %v243_v29, %v231_v31  ;;  %v246_v37 = vadd.f32 %v244_v30, %v232_v32 }
  0xa1   : > { %v259_v40 = vadd.f32 %v257_v34, %v245_v36  ;;  %v260_v41 = vadd.f32 %v258_v35, %v246_v37 }
  0xa3   : > { %v273_v43 = vadd.f32 %v271_v38, %v259_v40  ;;  %v274_v44 = vadd.f32 %v272_v39, %v260_v41 }
  0xa5   : > { %v281_v46 = vadd.f32 %v277_v42, %v274_v44  ;;  %v280_v47 = vadd.f32 %v276_v45, %v273_v43 }
  0xa7   : > { %v284_v48 = vrot.slane %v281_v46, 4 }
  0xa9   : > { %v286_v49 = vsel %vm285_vm0, %v280_v47, %v284_v48 }
  0xaa   : > { %288 = vst [vmem:[%s206_s6] sm:$0xff] %v286_v49 }
  0xab   : > { %537 = shalt.err (!%p534_p13)
}
  0xac   : > { %411 = dma.vmem_to_hbm [thread:$0]  (%p669_p9), %s306_s7, 128, %s308_s8, %s290_s15  }
  0xad PF: > { %s319_s11 = sand.u32 1, %s572_s12   ;;  %p418_p0 = pnand %p395_p12, %p676_p11 }
  0xae   : > { %s320_s28 = scalar_lea.sflag [#allocation4], %s319_s11 }
  0xaf   : > { %p419_p1 = pneg %p418_p0 }
  0xb1   : > { %567 = dma.done.wait (%p419_p1), %s320_s28, 128  }
  0xb2   : > { %569 = vsyncadd (%p419_p1), %s320_s28, 4294967168  ;;  %s19_s17 = sadd.s32 1, %s592_s17   ;;  %s756_s12 = smov %s576_s13 }
  0xb3   : > { %p16_p2 = scmp.ge.s32.totalorder %s19_s17, 4   ;;  %s757_s13 = smov %s580_s14 }
  0xb4   : > { %s758_s14 = smov %s674_s26  ;;  %s759_s15 = smov %s588_s16 }
  0xb5   : > { %s760_s16 = smov %s762_s20  ;;  %18 = sbr.rel (!%p16_p2) target bundleno = 6 (0x6), region = 77 }
  0xba   :  { %326 = vsyncpa [#allocation3], 1 }
  0xbb   :  { %328 = vsyncpa [#allocation3 + $0x1], 1 }
  0xbc   :  { %329 = vsyncpa [#allocation4], 1 }
  0xbd   :  { %331 = vsyncpa [#allocation4 + $0x1], 1 }

</bundles_post_ra>
